<compile_context>
chip_gen: v6e
topology: v6e:2x2x1
jax: 0.10.0
libtpu: 0.0.40
codegen_flags: <defaults>
</compile_context>

<pallas_src>
import jax
import jax.numpy as jnp
from jax.experimental import pallas as pl
from jax.experimental.pallas import tpu as pltpu

EMBED_DIM = int(96 * 2 ** 3)   # 768, matches nn.Linear(in_features=768, ...)
NUM_CLASSES = 3
NUM_HEADS = 5
LANE_PAD = 128                 # pad H*K=15 output lanes to one full 128-lane slab


def _fused_heads_kernel(emb_ref, w_ref, b_ref, out_ref):
    """Single-step fused kernel.

    emb_ref : [B, L, C]   bottleneck embeddings
    w_ref   : [C, P]      all 5 head weights, flattened+padded on the lane axis
    b_ref   : [1, P]      all 5 head biases, flattened+padded
    out_ref : [B, P]      lane-dense output slab
    """
    L = emb_ref.shape[1]
    inv_l = 1.0 / float(L)                                   # static constant
    pooled = jnp.sum(emb_ref[...], axis=1) * inv_l           # [B, C] mean-pool
    y = jnp.dot(pooled, w_ref[...],
                preferred_element_type=jnp.float32)          # [B, P]  one MXU push
    out_ref[...] = y + b_ref[...]                            # single broadcast add


def swu_multi_heads(x_emb, w_stack, b_stack):
    """x_emb: [B, L, C] f32; w_stack: [H, C, K] f32; b_stack: [H, K] f32.

    Returns [H, B, K] f32 where result[h] == x_emb.mean(1) @ w_stack[h] + b_stack[h],
    i.e. result[h] corresponds to PyTorch's fc{h+1}(x_emb_pool).
    """
    B, L, C = x_emb.shape
    H, _, K = w_stack.shape
    HK = H * K

    # Fuse the 5 heads into one lane-dense weight/bias slab (wrapper-side,
    # tiny, done once per call; folds away under jit for static params).
    w_flat = jnp.transpose(w_stack, (1, 0, 2)).reshape(C, HK)        # [C, 15]
    w_pad = jnp.zeros((C, LANE_PAD), jnp.float32).at[:, :HK].set(w_flat)
    b_pad = jnp.zeros((1, LANE_PAD), jnp.float32).at[:, :HK].set(
        b_stack.reshape(1, HK))

    out_flat = pl.pallas_call(
        _fused_heads_kernel,
        out_shape=jax.ShapeDtypeStruct((B, LANE_PAD), jnp.float32),
        in_specs=[
            pl.BlockSpec(memory_space=pltpu.MemorySpace.VMEM),   # x_emb, whole array
            pl.BlockSpec(memory_space=pltpu.MemorySpace.VMEM),   # fused weights
            pl.BlockSpec(memory_space=pltpu.MemorySpace.VMEM),   # fused bias
        ],
        out_specs=pl.BlockSpec(memory_space=pltpu.MemorySpace.VMEM),
    )(x_emb, w_pad, b_pad)

    # Lane-dense kernel output -> per-head layout [H, B, K] in the wrapper.
    return jnp.transpose(out_flat[:, :HK].reshape(B, H, K), (1, 0, 2))


def init_params(key):
    """Deterministic init matching PyTorch nn.Linear default: U(-1/sqrt(in), 1/sqrt(in))."""
    bound = 1.0 / (EMBED_DIM ** 0.5)
    kw, kb = jax.random.split(key)
    # stored as [H, in, out] (transposed w.r.t. PyTorch's [out, in]) for the matmul
    w = jax.random.uniform(kw, (NUM_HEADS, EMBED_DIM, NUM_CLASSES),
                           jnp.float32, -bound, bound)
    b = jax.random.uniform(kb, (NUM_HEADS, NUM_CLASSES),
                           jnp.float32, -bound, bound)
    return w, b


if __name__ == "__main__":
    key = jax.random.PRNGKey(0)
    k_emb, k_params = jax.random.split(key)

    B, L = 2, 8          # small batch / bottleneck sequence length
    C = EMBED_DIM        # 768, fixed by the module's fc in_features
    x_emb = jax.random.normal(k_emb, (B, L, C), jnp.float32)

    w_stack, b_stack = init_params(k_params)

    out = swu_multi_heads(x_emb, w_stack, b_stack)
    out = jax.block_until_ready(out)

    # Reference check in plain JAX (mirrors the PyTorch forward of the heads).
    pooled = x_emb.mean(axis=1)                               # [B, C]
    ref = jnp.einsum("bc,hck->hbk", pooled, w_stack) + b_stack[:, None, :]
    assert out.shape == (NUM_HEADS, B, NUM_CLASSES)
    assert jnp.allclose(out, ref, atol=1e-4, rtol=1e-4)

    # x_fc1 ... x_fc5 correspond to out[0] ... out[4].
    print("KERNEL_OK")
</pallas_src>

<mosaic_0001>
module attributes {stable_mosaic.version = 11 : i64} {
  func.func @_fused_heads_kernel(%arg0: memref<2x8x768xf32, #tpu.memory_space<vmem>>, %arg1: memref<768x128xf32, #tpu.memory_space<vmem>>, %arg2: memref<1x128xf32, #tpu.memory_space<vmem>>, %arg3: memref<2x128xf32, #tpu.memory_space<vmem>>) attributes {dimension_semantics = [], scalar_prefetch = 0 : i64, scratch_operands = 0 : i64, tpu.core_type = #tpu.core_type<tc>} {
    %c0 = arith.constant 0 : index
    %c0_0 = arith.constant 0 : index
    %c0_1 = arith.constant 0 : index
    %0 = vector.load %arg0[%c0, %c0_0, %c0_1] : memref<2x8x768xf32, #tpu.memory_space<vmem>>, vector<2x8x768xf32>
    %cst = arith.constant dense<0.000000e+00> : vector<2x768xf32>
    %1 = vector.multi_reduction <add>, %0, %cst [1] : vector<2x8x768xf32> to vector<2x768xf32>
    %cst_2 = arith.constant 1.250000e-01 : f32
    %2 = vector.broadcast %cst_2 : f32 to vector<2x768xf32>
    %3 = arith.mulf %1, %2 : vector<2x768xf32>
    %c0_3 = arith.constant 0 : index
    %c0_4 = arith.constant 0 : index
    %4 = vector.load %arg1[%c0_3, %c0_4] : memref<768x128xf32, #tpu.memory_space<vmem>>, vector<768x128xf32>
    %cst_5 = arith.constant dense<0.000000e+00> : vector<2x128xf32>
    %5 = tpu.matmul %3, %4, %cst_5 {dimension_numbers = #tpu.dot_dimension_numbers<[1], [0], [0], [1], [0, 0, 1, 1], [], []>} : vector<2x768xf32>, vector<768x128xf32>, vector<2x128xf32> -> vector<2x128xf32>
    %c0_6 = arith.constant 0 : index
    %c0_7 = arith.constant 0 : index
    %6 = vector.load %arg2[%c0_6, %c0_7] : memref<1x128xf32, #tpu.memory_space<vmem>>, vector<1x128xf32>
    %7 = vector.broadcast %6 : vector<1x128xf32> to vector<2x128xf32>
    %8 = arith.addf %5, %7 : vector<2x128xf32>
    %c0_8 = arith.constant 0 : index
    %c0_9 = arith.constant 0 : index
    %9 = vector.load %arg3[%c0_8, %c0_9] : memref<2x128xf32, #tpu.memory_space<vmem>>, vector<2x128xf32>
    tpu.vector_store %arg3[%c0_8, %c0_9], %8 {strides = array<i32>} : memref<2x128xf32, #tpu.memory_space<vmem>>, vector<2x128xf32>,
    return
  }
}

</mosaic_0001>

<bundles_post_ra>
// kernel: tpu_custom_call.1
= control target key start
LH: loop header
LB: loop body
LE: loop exit
PB: predicated region body
PF: predicated region fallthrough
CT: control target
= control target key end

     0   :  { %8 = vsyncpa [#allocation3], 0  ;;  %s718_s0 = inlined_call_operand.hbm [shape: f32[2,8,768], index: 0, kind: input, shape index: {}]   ;;  %s719_s1 = inlined_call_operand.hbm [shape: f32[768,128], index: 1, kind: input, shape index: {}]   ;;  %s720_s2 = inlined_call_operand.vmem [shape: f32[1,128], index: 2, kind: input, shape index: {}]   ;;  %s721_s3 = inlined_call_operand.hbm [shape: f32[2,128], index: 3, kind: output, shape index: {}]  }
   0x1   :  { %9 = vsyncpa [#allocation6], 0 }
   0x2   :  { %10 = vsyncpa [#allocation4], 0  ;;  %s673_s12 = smov [#allocation2]  }
   0x3   :  { %s16_s13 = sshll.u32 %s673_s12, 4  ;;  %s17_s13 = int_to_ptr.vmem [resolvable:$true] %s16_s13 }
   0x4   :  { %s615_s14 = scalar_lea.vmem %s17_s13, 1536  ;;  %p620_p1 = scmp.lt.s32.totalorder %s17_s13, %s17_s13 }
   0x5   :  { %p616_p0 = scmp.ne.s32.totalorder %s17_s13, %s615_s14  ;;  %p621_p2 = scmp.lt.s32.totalorder %s615_s14, %s615_s14 }
   0x7   :  { %p622_p3 = por %p621_p2, %p620_p1 }
   0x9   :  { %p623_p4 = pnand %p622_p3, %p616_p0 }
   0xb   :  { %626 = shalt.err (!%p623_p4)
}
   0xc   :  { %s674_s15 = smov 768   ;;  %s675_s16 = smov 48  }
   0xd   :  { %22 = dma.hbm_to_vmem [thread:$0]  %s718_s0, 1536, %s17_s13, [#allocation3], %s674_s15, %s674_s15, %s675_s16  }
   0xe   :  { %s676_s19 = smov [#allocation5]  }
   0xf   :  { %s28_s20 = sshll.u32 %s676_s19, 4  ;;  %s29_s20 = int_to_ptr.vmem [resolvable:$true] %s28_s20 }
  0x10   :  { %s635_s21 = scalar_lea.vmem %s29_s20, 12288  ;;  %p640_p6 = scmp.lt.s32.totalorder %s29_s20, %s29_s20 }
  0x11   :  { %p636_p5 = scmp.ne.s32.totalorder %s29_s20, %s635_s21  ;;  %p641_p7 = scmp.lt.s32.totalorder %s635_s21, %s635_s21 }
  0x13   :  { %p642_p8 = por %p641_p7, %p640_p6 }
  0x15   :  { %p643_p9 = pnand %p642_p8, %p636_p5 }
  0x17   :  { %646 = shalt.err (!%p643_p9)
}
  0x18   :  { %s677_s22 = smov 128   ;;  %s678_s23 = smov 8  }
  0x19   :  { %34 = dma.hbm_to_vmem [thread:$0]  %s719_s1, 12288, %s29_s20, [#allocation6], %s677_s22, %s677_s22, %s678_s23  }
  0x1a   :  { %667 = dma.done.wait [#allocation3], 1536  }
  0x1b   :  { %668 = vsyncadd [#allocation3], 4294965760 }
  0x1c   :  { %669 = dma.done.wait [#allocation6], 12288  }
  0x1d   :  { %670 = vsyncadd [#allocation6], 4294955008  ;;  %v170_v0 = vld [vmem:[#allocation5 + $0xf8] sm:$0xff]  ;;  %v169_v2 = vld [vmem:[#allocation5 + $0xf0] sm:$0xff]  ;;  %vm254_vm0 = vcmask 1041409   ;;  %s679_s26 = smov [#allocation7]  }
  0x1e   :  { %v154_v1 = vld [vmem:[#allocation5 + $0x78] sm:$0xff]  ;;  %495 = vmatprep.subr.mxu0 %v170_v0  ;;  %v153_v4 = vld [vmem:[#allocation5 + $0x70] sm:$0xff]  ;;  %v168_v6 = vld [vmem:[#allocation5 + $0xe8] sm:$0xff]  ;;  %s484_s27 = sshll.u32 %s679_s26, 4  ;;  %s485_s27 = int_to_ptr.vmem [resolvable:$true] %s484_s27 }
  0x1f   :  { %v202_v3 = vld [vmem:[#allocation5 + $0x1f8] sm:$0xff]  ;;  %496 = vmatpush3.msra.mxu0 %v154_v1  ;;  %v201_v7 = vld [vmem:[#allocation5 + $0x1f0] sm:$0xff]  ;;  %v152_v8 = vld [vmem:[#allocation5 + $0x68] sm:$0xff]  ;;  %s647_s28 = scalar_lea.vmem %s485_s27, 32  ;;  %p652_p11 = scmp.lt.s32.totalorder %s485_s27, %s485_s27 }
  0x20   :  { %v186_v5 = vld [vmem:[#allocation5 + $0x178] sm:$0xff]  ;;  %530 = vmatprep.subr.mxu1 %v202_v3  ;;  %497 = vmatprep.subr.mxu0 %v169_v2  ;;  %v185_v9 = vld [vmem:[#allocation5 + $0x170] sm:$0xff]  ;;  %v200_v10 = vld [vmem:[#allocation5 + $0x1e8] sm:$0xff]  ;;  %p648_p10 = scmp.ne.s32.totalorder %s485_s27, %s647_s28  ;;  %p653_p12 = scmp.lt.s32.totalorder %s647_s28, %s647_s28 }
  0x21   :  { %531 = vmatpush3.msra.mxu1 %v186_v5  ;;  %498 = vmatpush3.msra.mxu0 %v153_v4  ;;  %v167_v11 = vld [vmem:[#allocation5 + $0xe0] sm:$0xff]  ;;  %v184_v12 = vld [vmem:[#allocation5 + $0x168] sm:$0xff]  ;;  %v166_v15 = vld [vmem:[#allocation5 + $0xd8] sm:$0xff] }
  0x22   :  { %532 = vmatprep.subr.mxu1 %v201_v7  ;;  %499 = vmatprep.subr.mxu0 %v168_v6  ;;  %v151_v13 = vld [vmem:[#allocation5 + $0x60] sm:$0xff]  ;;  %v150_v17 = vld [vmem:[#allocation5 + $0x58] sm:$0xff]  ;;  %v165_v19 = vld [vmem:[#allocation5 + $0xd0] sm:$0xff]  ;;  %p654_p13 = por %p653_p12, %p652_p11 }
  0x23   :  { %533 = vmatpush3.msra.mxu1 %v185_v9  ;;  %v199_v14 = vld [vmem:[#allocation5 + $0x1e0] sm:$0xff]  ;;  %500 = vmatpush3.msra.mxu0 %v152_v8  ;;  %v198_v18 = vld [vmem:[#allocation5 + $0x1d8] sm:$0xff]  ;;  %v149_v21 = vld [vmem:[#allocation5 + $0x50] sm:$0xff] }
  0x24   :  { %534 = vmatprep.subr.mxu1 %v200_v10  ;;  %v183_v16 = vld [vmem:[#allocation5 + $0x160] sm:$0xff]  ;;  %501 = vmatprep.subr.mxu0 %v167_v11  ;;  %v182_v20 = vld [vmem:[#allocation5 + $0x158] sm:$0xff]  ;;  %v197_v22 = vld [vmem:[#allocation5 + $0x1d0] sm:$0xff]  ;;  %p655_p0 = pnand %p654_p13, %p648_p10 }
  0x25   :  { %535 = vmatpush3.msra.mxu1 %v184_v12  ;;  %502 = vmatpush3.msra.mxu0 %v151_v13  ;;  %v164_v23 = vld [vmem:[#allocation5 + $0xc8] sm:$0xff]  ;;  %v181_v24 = vld [vmem:[#allocation5 + $0x150] sm:$0xff]  ;;  %v163_v27 = vld [vmem:[#allocation5 + $0xc0] sm:$0xff] }
  0x26   :  { %536 = vmatprep.subr.mxu1 %v199_v14  ;;  %503 = vmatprep.subr.mxu0 %v166_v15  ;;  %v148_v25 = vld [vmem:[#allocation5 + $0x48] sm:$0xff]  ;;  %v147_v29 = vld [vmem:[#allocation5 + $0x40] sm:$0xff]  ;;  %v162_v31 = vld [vmem:[#allocation5 + $0xb8] sm:$0xff] }
  0x27   :  { %537 = vmatpush3.msra.mxu1 %v183_v16  ;;  %504 = vmatpush3.msra.mxu0 %v150_v17  ;;  %v196_v26 = vld [vmem:[#allocation5 + $0x1c8] sm:$0xff]  ;;  %v195_v30 = vld [vmem:[#allocation5 + $0x1c0] sm:$0xff]  ;;  %v146_v33 = vld [vmem:[#allocation5 + $0x38] sm:$0xff] }
  0x28   :  { %538 = vmatprep.subr.mxu1 %v198_v18  ;;  %505 = vmatprep.subr.mxu0 %v165_v19  ;;  %v180_v28 = vld [vmem:[#allocation5 + $0x148] sm:$0xff]  ;;  %v179_v32 = vld [vmem:[#allocation5 + $0x140] sm:$0xff]  ;;  %v194_v34 = vld [vmem:[#allocation5 + $0x1b8] sm:$0xff] }
  0x29   :  { %539 = vmatpush3.msra.mxu1 %v182_v20  ;;  %506 = vmatpush3.msra.mxu0 %v149_v21  ;;  %v161_v35 = vld [vmem:[#allocation5 + $0xb0] sm:$0xff]  ;;  %v178_v36 = vld [vmem:[#allocation5 + $0x138] sm:$0xff]  ;;  %v160_v38 = vld [vmem:[#allocation5 + $0xa8] sm:$0xff] }
  0x2a   :  { %540 = vmatprep.subr.mxu1 %v197_v22  ;;  %507 = vmatprep.subr.mxu0 %v164_v23  ;;  %v145_v37 = vld [vmem:[#allocation5 + $0x30] sm:$0xff]  ;;  %v144_v40 = vld [vmem:[#allocation5 + $0x28] sm:$0xff]  ;;  %v159_v42 = vld [vmem:[#allocation5 + $0xa0] sm:$0xff] }
  0x2b   :  { %541 = vmatpush3.msra.mxu1 %v181_v24  ;;  %508 = vmatpush3.msra.mxu0 %v148_v25  ;;  %v193_v39 = vld [vmem:[#allocation5 + $0x1b0] sm:$0xff]  ;;  %v192_v43 = vld [vmem:[#allocation5 + $0x1a8] sm:$0xff]  ;;  %v143_v44 = vld [vmem:[#allocation5 + $0x20] sm:$0xff] }
  0x2c   :  { %542 = vmatprep.subr.mxu1 %v196_v26  ;;  %509 = vmatprep.subr.mxu0 %v163_v27  ;;  %v177_v41 = vld [vmem:[#allocation5 + $0x130] sm:$0xff]  ;;  %v176_v45 = vld [vmem:[#allocation5 + $0x128] sm:$0xff]  ;;  %v158_v46 = vld [vmem:[#allocation5 + $0x98] sm:$0xff] }
  0x2d   :  { %543 = vmatpush3.msra.mxu1 %v180_v28  ;;  %510 = vmatpush3.msra.mxu0 %v147_v29  ;;  %v44_v47 = vld [vmem:[#allocation2 + $0x8] sm:$0xff]  ;;  %v50_v48 = vld [vmem:[#allocation2 + $0x38] sm:$0xff]  ;;  %v191_v49 = vld [vmem:[#allocation5 + $0x1a0] sm:$0xff] }
  0x2e   :  { %544 = vmatprep.subr.mxu1 %v195_v30  ;;  %511 = vmatprep.subr.mxu0 %v162_v31  ;;  %v61_v50 = vrot.slane %v44_v47, 4  ;;  %v97_v51 = vrot.slane %v50_v48, 4  ;;  %v43_v52 = vld [vmem:[#allocation2] sm:$0xff]  ;;  %v49_v53 = vld [vmem:[#allocation2 + $0x30] sm:$0xff]  ;;  %v142_v54 = vld [vmem:[#allocation5 + $0x18] sm:$0xff] }
  0x2f   :  { %545 = vmatpush3.msra.mxu1 %v179_v32  ;;  %512 = vmatpush3.msra.mxu0 %v146_v33  ;;  %v175_v55 = vld [vmem:[#allocation5 + $0x120] sm:$0xff]  ;;  %v157_v56 = vld [vmem:[#allocation5 + $0x90] sm:$0xff]  ;;  %v55_v57 = vrot.slane %v43_v52, 4  ;;  %v91_v58 = vrot.slane %v49_v53, 4  ;;  %v190_v59 = vld [vmem:[#allocation5 + $0x198] sm:$0xff] }
  0x30   :  { %546 = vmatprep.subr.mxu1 %v194_v34  ;;  %513 = vmatprep.subr.mxu0 %v161_v35  ;;  %v62_v60 = vadd.f32 %v61_v50, %v44_v47  ;;  %v98_v61 = vadd.f32 %v97_v51, %v50_v48  ;;  %v46_v62 = vld [vmem:[#allocation2 + $0x18] sm:$0xff]  ;;  %v52_v63 = vld [vmem:[#allocation2 + $0x48] sm:$0xff]  ;;  %v45_v5 = vld [vmem:[#allocation2 + $0x10] sm:$0xff] }
  0x31   :  { %547 = vmatpush3.msra.mxu1 %v178_v36  ;;  %514 = vmatpush3.msra.mxu0 %v145_v37  ;;  %v174_v0 = vld [vmem:[#allocation5 + $0x118] sm:$0xff]  ;;  %v56_v1 = vadd.f32 %v55_v57, %v43_v52  ;;  %v92_v2 = vadd.f32 %v91_v58, %v49_v53  ;;  %v73_v3 = vrot.slane %v46_v62, 4  ;;  %v109_v4 = vrot.slane %v52_v63, 4  ;;  %v51_v6 = vld [vmem:[#allocation2 + $0x40] sm:$0xff]  ;;  %v141_v7 = vld [vmem:[#allocation5 + $0x10] sm:$0xff] }
  0x32   :  { %548 = vmatprep.subr.mxu1 %v193_v39  ;;  %515 = vmatprep.subr.mxu0 %v160_v38  ;;  %v189_v8 = vld [vmem:[#allocation5 + $0x190] sm:$0xff]  ;;  %v63_v9 = vrot.slane %v62_v60, 2  ;;  %v99_v10 = vrot.slane %v98_v61, 2  ;;  %v67_v11 = vrot.slane %v45_v5, 4  ;;  %v103_v12 = vrot.slane %v51_v6, 4  ;;  %v156_v13 = vld [vmem:[#allocation5 + $0x88] sm:$0xff] }
  0x33   :  { %549 = vmatpush3.msra.mxu1 %v177_v41  ;;  %516 = vmatpush3.msra.mxu0 %v144_v40  ;;  %v173_v14 = vld [vmem:[#allocation5 + $0x110] sm:$0xff]  ;;  %v57_v15 = vrot.slane %v56_v1, 2  ;;  %v93_v16 = vrot.slane %v92_v2, 2  ;;  %v74_v17 = vadd.f32 %v73_v3, %v46_v62  ;;  %v110_v18 = vadd.f32 %v109_v4, %v52_v63  ;;  %v140_v19 = vld [vmem:[#allocation5 + $0x8] sm:$0xff]  ;;  %v155_v24 = vld [vmem:[#allocation5 + $0x80] sm:$0xff] }
  0x34   :  { %550 = vmatprep.subr.mxu1 %v192_v43  ;;  %517 = vmatprep.subr.mxu0 %v159_v42  ;;  %v188_v20 = vld [vmem:[#allocation5 + $0x188] sm:$0xff]  ;;  %v64_v21 = vadd.f32 %v63_v9, %v62_v60  ;;  %v100_v22 = vadd.f32 %v99_v10, %v98_v61  ;;  %v68_v23 = vadd.f32 %v67_v11, %v45_v5  ;;  %v139_v30 = vld [vmem:[#allocation5] sm:$0xff]  ;;  %v234_v38 = vld [vmem:[#allocation5 + $0x2f8] sm:$0xff] }
  0x35   :  { %551 = vmatpush3.msra.mxu1 %v176_v45  ;;  %518 = vmatpush3.msra.mxu0 %v143_v44  ;;  %v172_v25 = vld [vmem:[#allocation5 + $0x108] sm:$0xff]  ;;  %v58_v26 = vadd.f32 %v57_v15, %v56_v1  ;;  %v94_v27 = vadd.f32 %v93_v16, %v92_v2  ;;  %v75_v28 = vrot.slane %v74_v17, 2  ;;  %v111_v29 = vrot.slane %v110_v18, 2  ;;  %v187_v33 = vld [vmem:[#allocation5 + $0x180] sm:$0xff]  ;;  %v218_v58 = vld [vmem:[#allocation5 + $0x278] sm:$0xff] }
  0x36   :  { %552 = vmatprep.subr.mxu1 %v191_v49  ;;  %519 = vmatprep.subr.mxu0 %v158_v46  ;;  %v65_v31 = vrot.slane %v64_v21, 1  ;;  %v101_v32 = vrot.slane %v100_v22, 1  ;;  %v69_v34 = vrot.slane %v68_v23, 2  ;;  %v104_v35 = vadd.f32 %v103_v12, %v51_v6  ;;  %v171_v39 = vld [vmem:[#allocation5 + $0x100] sm:$0xff]  ;;  %v48_v62 = vld [vmem:[#allocation2 + $0x28] sm:$0xff]  ;;  %v54_v63 = vld [vmem:[#allocation2 + $0x58] sm:$0xff] }
  0x37   :  { %553 = vmatpush3.msra.mxu1 %v175_v55  ;;  %520 = vmatpush3.msra.mxu0 %v142_v54  ;;  %v59_v36 = vrot.slane %v58_v26, 1  ;;  %v95_v37 = vrot.slane %v94_v27, 1  ;;  %v76_v40 = vadd.f32 %v75_v28, %v74_v17  ;;  %v112_v41 = vadd.f32 %v111_v29, %v110_v18  ;;  %v233_v4 = vld [vmem:[#allocation5 + $0x2f0] sm:$0xff]  ;;  %v232_v12 = vld [vmem:[#allocation5 + $0x2e8] sm:$0xff]  ;;  %v214_v28 = vld [vmem:[#allocation5 + $0x258] sm:$0xff] }
  0x38   :  { %554 = vmatprep.subr.mxu1 %v190_v59  ;;  %521 = vmatprep.subr.mxu0 %v157_v56  ;;  %v66_v42 = vadd.f32 %v65_v31, %v64_v21  ;;  %v102_v43 = vadd.f32 %v101_v32, %v100_v22  ;;  %v70_v44 = vadd.f32 %v69_v34, %v68_v23  ;;  %v105_v45 = vrot.slane %v104_v35, 2  ;;  %v53_v6 = vld [vmem:[#allocation2 + $0x50] sm:$0xff]  ;;  %v216_v17 = vld [vmem:[#allocation5 + $0x268] sm:$0xff]  ;;  %v215_v22 = vld [vmem:[#allocation5 + $0x260] sm:$0xff] }
  0x39   :  { %555 = vmatpush3.msra.mxu1 %v174_v0  ;;  %522 = vmatpush3.msra.mxu0 %v141_v7  ;;  %v60_v46 = vadd.f32 %v59_v36, %v58_v26  ;;  %v96_v47 = vadd.f32 %v95_v37, %v94_v27  ;;  %v77_v48 = vrot.slane %v76_v40, 1  ;;  %v113_v49 = vrot.slane %v112_v41, 1  ;;  %v47_v0 = vld [vmem:[#allocation2 + $0x20] sm:$0xff]  ;;  %v217_v9 = vld [vmem:[#allocation5 + $0x270] sm:$0xff]  ;;  %v228_v34 = vld [vmem:[#allocation5 + $0x2c8] sm:$0xff] }
  0x3a   :  { %556 = vmatprep.subr.mxu1 %v189_v8  ;;  %523 = vmatprep.subr.mxu0 %v156_v13  ;;  %v128_v50 = vmul.f32 0.125, %v66_v42  ;;  %v134_v51 = vmul.f32 0.125, %v102_v43  ;;  %v71_v52 = vrot.slane %v70_v44, 1  ;;  %v106_v53 = vadd.f32 %v105_v45, %v104_v35  ;;  %v213_v32 = vld [vmem:[#allocation5 + $0x250] sm:$0xff]  ;;  %v211_v42 = vld [vmem:[#allocation5 + $0x240] sm:$0xff] }
  0x3b   :  { %557 = vmatpush3.msra.mxu1 %v173_v14  ;;  %524 = vmatpush3.msra.mxu0 %v140_v19  ;;  %v127_v54 = vmul.f32 0.125, %v60_v46  ;;  %v133_v55 = vmul.f32 0.125, %v96_v47  ;;  %v78_v56 = vadd.f32 %v77_v48, %v76_v40  ;;  %v114_v57 = vadd.f32 %v113_v49, %v112_v41  ;;  %v231_v19 = vld [vmem:[#allocation5 + $0x2e0] sm:$0xff]  ;;  %v210_v47 = vld [vmem:[#allocation5 + $0x238] sm:$0xff]  ;;  %v225_v49 = vld [vmem:[#allocation5 + $0x2b0] sm:$0xff] }
  0x3c   :  { %558 = vmatprep.subr.mxu1 %v188_v20  ;;  %525 = vmatprep.subr.mxu0 %v155_v24  ;;  %v256_v59 = vsel %vm254_vm0, %v134_v51, %v128_v50  ;;  %v72_v60 = vadd.f32 %v71_v52, %v70_v44  ;;  %v107_v61 = vrot.slane %v106_v53, 1  ;;  %v85_v5 = vrot.slane %v48_v62, 4  ;;  %v230_v24 = vld [vmem:[#allocation5 + $0x2d8] sm:$0xff]  ;;  %v227_v40 = vld [vmem:[#allocation5 + $0x2c0] sm:$0xff]  ;;  %v209_v50 = vld [vmem:[#allocation5 + $0x230] sm:$0xff] }
  0x3d   :  { %559 = vmatpush3.msra.mxu1 %v172_v25  ;;  %526 = vmatpush3.msra.mxu0 %v139_v30  ;;  %v255_v1 = vsel %vm254_vm0, %v133_v55, %v127_v54  ;;  %v130_v2 = vmul.f32 0.125, %v78_v56  ;;  %v136_v3 = vmul.f32 0.125, %v114_v57  ;;  %v121_v10 = vrot.slane %v54_v63, 4  ;;  %v229_v30 = vld [vmem:[#allocation5 + $0x2d0] sm:$0xff]  ;;  %v226_v44 = vld [vmem:[#allocation5 + $0x2b8] sm:$0xff]  ;;  %v224_v51 = vld [vmem:[#allocation5 + $0x2a8] sm:$0xff] }
  0x3e   :  { %560 = vmatprep.subr.mxu1 %v187_v33  ;;  %565 = vmatprep.subr.mxu0 %v234_v38  ;;  %v108_v7 = vadd.f32 %v107_v61, %v106_v53  ;;  %v129_v8 = vmul.f32 0.125, %v72_v60  ;;  %v86_v13 = vadd.f32 %v85_v5, %v48_v62  ;;  %v79_v14 = vrot.slane %v47_v0, 4  ;;  %v212_v38 = vld [vmem:[#allocation5 + $0x248] sm:$0xff]  ;;  %v223_v55 = vld [vmem:[#allocation5 + $0x2a0] sm:$0xff]  ;;  %v222_v57 = vld [vmem:[#allocation5 + $0x298] sm:$0xff] }
  0x3f   :  { %561 = vmatpush3.msra.mxu1 %v171_v39  ;;  %331 = vmatprep.mubr.f32.mxu0 %v256_v59  ;;  %v258_v11 = vsel %vm254_vm0, %v136_v3, %v130_v2  ;;  %v115_v15 = vrot.slane %v53_v6, 4  ;;  %v122_v18 = vadd.f32 %v121_v10, %v54_v63  ;;  %v208_v54 = vld [vmem:[#allocation5 + $0x228] sm:$0xff]  ;;  %v207_v56 = vld [vmem:[#allocation5 + $0x220] sm:$0xff]  ;;  %v206_v60 = vld [vmem:[#allocation5 + $0x218] sm:$0xff] }
  0x40   :  { %332 = vmatmul.mubr.f32.vlgmr.msra.gmra.mxu0 %v255_v1  ;;  %401 = vmatprep.mubr.f32.mxu1 %v258_v11  ;;  %v135_v16 = vmul.f32 0.125, %v108_v7  ;;  %v87_v20 = vrot.slane %v86_v13, 2  ;;  %v80_v26 = vadd.f32 %v79_v14, %v47_v0  ;;  %v221_v61 = vld [vmem:[#allocation5 + $0x290] sm:$0xff]  ;;  %v220_v63 = vld [vmem:[#allocation5 + $0x288] sm:$0xff]  ;;  %v219_v3 = vld [vmem:[#allocation5 + $0x280] sm:$0xff] }
  0x41   :  { %566 = vmatpush3.msra.mxu0 %v218_v58  ;;  %v123_v23 = vrot.slane %v122_v18, 2  ;;  %v116_v27 = vadd.f32 %v115_v15, %v53_v6  ;;  %v205_v62 = vld [vmem:[#allocation5 + $0x210] sm:$0xff]  ;;  %v204_v2 = vld [vmem:[#allocation5 + $0x208] sm:$0xff]  ;;  %v494_v10 = vld [vmem:[%s720_s2] ss:$0 sm:$0xff] }
  0x42   :  { %567 = vmatprep.subr.mxu0 %v233_v4  ;;  %v257_v21 = vsel %vm254_vm0, %v135_v16, %v129_v8  ;;  %v88_v25 = vadd.f32 %v87_v20, %v86_v13  ;;  %v81_v36 = vrot.slane %v80_v26, 2  ;;  %v203_v4 = vld [vmem:[#allocation5 + $0x200] sm:$0xff] }
  0x43   :  { %568 = vmatpush3.msra.mxu0 %v217_v9  ;;  %402 = vmatmul.mubr.f32.vlgmr.msra.gmra.mxu1 %v257_v21  ;;  %v124_v29 = vadd.f32 %v123_v23, %v122_v18  ;;  %v117_v37 = vrot.slane %v116_v27, 2 }
  0x44   :  { %569 = vmatprep.subr.mxu0 %v232_v12  ;;  %v89_v31 = vrot.slane %v88_v25, 1  ;;  %v82_v45 = vadd.f32 %v81_v36, %v80_v26 }
  0x45   :  { %570 = vmatpush3.msra.mxu0 %v216_v17  ;;  %v125_v33 = vrot.slane %v124_v29, 1  ;;  %v118_v46 = vadd.f32 %v117_v37, %v116_v27 }
  0x46   :  { %571 = vmatprep.subr.mxu0 %v231_v19  ;;  %v90_v35 = vadd.f32 %v89_v31, %v88_v25  ;;  %v83_v52 = vrot.slane %v82_v45, 1 }
  0x47   :  { %572 = vmatpush3.msra.mxu0 %v215_v22  ;;  %v126_v39 = vadd.f32 %v125_v33, %v124_v29  ;;  %v119_v53 = vrot.slane %v118_v46, 1 }
  0x48   :  { %573 = vmatprep.subr.mxu0 %v230_v24  ;;  %v132_v41 = vmul.f32 0.125, %v90_v35  ;;  %v84_v58 = vadd.f32 %v83_v52, %v82_v45 }
  0x49   :  { %574 = vmatpush3.msra.mxu0 %v214_v28  ;;  %v138_v43 = vmul.f32 0.125, %v126_v39  ;;  %v120_v59 = vadd.f32 %v119_v53, %v118_v46 }
  0x4a   :  { %575 = vmatprep.subr.mxu0 %v229_v30  ;;  %v131_v0 = vmul.f32 0.125, %v84_v58 }
  0x4b   :  { %576 = vmatpush3.msra.mxu0 %v213_v32  ;;  %v260_v48 = vsel %vm254_vm0, %v138_v43, %v132_v41  ;;  %v137_v1 = vmul.f32 0.125, %v120_v59 }
  0x4c   :  { %577 = vmatprep.subr.mxu0 %v228_v34  ;;  %471 = vmatprep.mubr.f32.mxu0 %v260_v48 }
  0x4d   :  { %578 = vmatpush3.msra.mxu0 %v212_v38  ;;  %v259_v5 = vsel %vm254_vm0, %v137_v1, %v131_v0 }
  0x4e   :  { %579 = vmatprep.subr.mxu0 %v227_v40 }
  0x4f   :  { %580 = vmatpush3.msra.mxu0 %v211_v42 }
  0x50   :  { %581 = vmatprep.subr.mxu0 %v226_v44 }
  0x51   :  { %582 = vmatpush3.msra.mxu0 %v210_v47 }
  0x52   :  { %583 = vmatprep.subr.mxu0 %v225_v49 }
  0x53   :  { %584 = vmatpush3.msra.mxu0 %v209_v50 }
  0x54   :  { %585 = vmatprep.subr.mxu0 %v224_v51 }
  0x55   :  { %586 = vmatpush3.msra.mxu0 %v208_v54 }
  0x56   :  { %587 = vmatprep.subr.mxu0 %v223_v55 }
  0x57   :  { %588 = vmatpush3.msra.mxu0 %v207_v56 }
  0x58   :  { %589 = vmatprep.subr.mxu0 %v222_v57 }
  0x59   :  { %590 = vmatpush3.msra.mxu0 %v206_v60 }
  0x5a   :  { %591 = vmatprep.subr.mxu0 %v221_v61 }
  0x5b   :  { %592 = vmatpush3.msra.mxu0 %v205_v62 }
  0x5c   :  { %593 = vmatprep.subr.mxu0 %v220_v63 }
  0x5d   :  { %594 = vmatpush3.msra.mxu0 %v204_v2 }
  0x5e   :  { %595 = vmatprep.subr.mxu0 %v219_v3 }
  0x5f   :  { %596 = vmatpush3.msra.mxu0 %v203_v4 }
  0x60   :  { %472 = vmatmul.mubr.f32.vlgmr.msra.gmra.mxu0 %v259_v5 }
 0x100   :  { %v527_v6 = vpop.f32.mrf.mxu0 }
 0x102   :  { %v528_v7 = vpop.f32.mrf.mxu0 }
 0x103   :  { %v562_v8 = vpop.f32.mrf.mxu1  ;;  %v529_v9 = vadd.f32 %v528_v7, %v527_v6 }
 0x105   :  { %v563_v11 = vpop.f32.mrf.mxu1  ;;  %v334_v12 = vadd.f32 %v529_v9, %v494_v10 }
 0x106   :  { %v564_v13 = vadd.f32 %v563_v11, %v562_v8 }
 0x108   :  { %v404_v16 = vadd.f32 %v564_v13, %v334_v12 }
 0x120   :  { %v597_v14 = vpop.f32.mrf.mxu0 }
 0x122   :  { %v598_v15 = vpop.f32.mrf.mxu0 }
 0x123   :  { %v599_v17 = vadd.f32 %v598_v15, %v597_v14 }
 0x125   :  { %v474_v18 = vadd.f32 %v599_v17, %v404_v16 }
 0x127   :  { %477 = vst [vmem:[#allocation7] sm:$0x3] %v474_v18 }
 0x128   :  { %658 = shalt.err (!%p655_p0)
}
 0x129   :  { %487 = dma.vmem_to_hbm [thread:$0]  %s485_s27, 32, %s721_s3, [#allocation4]  }
 0x12a   :  { %671 = dma.done.wait [#allocation4], 32  }
 0x12b   :  { %672 = vsyncadd [#allocation4], 4294967264 }
 0x12c   :  { %491 = vsyncpa [#allocation3], 1 }
 0x12d   :  { %492 = vsyncpa [#allocation6], 1 }
 0x12e   :  { %493 = vsyncpa [#allocation4], 1 }

</bundles_post_ra>
